<compile_context>
chip_gen: v6e
topology: v6e:2x2x1
jax: 0.10.0
libtpu: 0.0.40
codegen_flags: <defaults>
</compile_context>

<pallas_src>
import jax
import jax.numpy as jnp
from jax.experimental import pallas as pl
from jax.experimental.pallas import tpu as pltpu


def _round_up(v, m):
    return ((v + m - 1) // m) * m


def _chip_info():
    """(vmem_capacity_bytes, feature-dim alignment) for the local TPU."""
    try:
        vmem_cap = int(pltpu.get_tpu_info().vmem_capacity_bytes)
    except Exception:
        vmem_cap = 64 * 2**20          # conservative (v7x-sized) fallback
    vmem_cap = max(vmem_cap, 48 * 2**20)
    kind = ""
    try:
        kind = jax.devices()[0].device_kind.lower()
    except Exception:
        pass
    # v6e / v7x have 2x256x256 MXUs -> 256-wide K/N tiles for full occupancy;
    # v5e (4x128x128) and unknown chips keep 128 (always layout-legal).
    align = 256 if ("v6" in kind or "v7" in kind) else 128
    return vmem_cap, align


# ----------------------------- kernel bodies ------------------------------ #

def _ff_kernel_f32_out(x_ref, w1_ref, b1_ref, w2_ref, b2_ref, o_ref):
    """f32 output: accumulate directly into the resident output block."""
    k = pl.program_id(2)

    @pl.when(k == 0)
    def _init():
        o_ref[...] = jnp.broadcast_to(b2_ref[...], o_ref.shape)

    h = jnp.dot(x_ref[...], w1_ref[...], preferred_element_type=jnp.float32)
    h = jnp.maximum(h + b1_ref[...], 0.0)
    o_ref[...] += jnp.dot(h.astype(w2_ref.dtype), w2_ref[...],
                          preferred_element_type=jnp.float32)


def _ff_kernel_scratch(x_ref, w1_ref, b1_ref, w2_ref, b2_ref, o_ref, acc_ref):
    """Narrow output dtypes: f32 accumulator scratch, cast on the last k."""
    k = pl.program_id(2)

    @pl.when(k == 0)
    def _init():
        acc_ref[...] = jnp.zeros_like(acc_ref)

    h = jnp.dot(x_ref[...], w1_ref[...], preferred_element_type=jnp.float32)
    h = jnp.maximum(h + b1_ref[...], 0.0)
    acc_ref[...] += jnp.dot(h.astype(w2_ref.dtype), w2_ref[...],
                            preferred_element_type=jnp.float32)

    @pl.when(k == pl.num_programs(2) - 1)
    def _finalize():
        o_ref[...] = (acc_ref[...] + b2_ref[...]).astype(o_ref.dtype)


# ------------------------------- wrapper ---------------------------------- #

class PallasFeedForward:
    """relu(x @ W1 + b1) @ W2 + b2 as one Pallas TPU kernel.

    Weights are padded / cast once at construction; tile sizes and the VMEM
    limit are derived from the chip's VMEM capacity.
    """

    def __init__(self, w1, b1, w2, b2, *, compute_dtype=jnp.bfloat16,
                 row_tile=None):
        w1 = jnp.asarray(w1); b1 = jnp.asarray(b1)
        w2 = jnp.asarray(w2); b2 = jnp.asarray(b2)
        D_in, H = w1.shape
        H2, D_out = w2.shape
        assert H == H2 and b1.shape == (H,) and b2.shape == (D_out,)
        self.D_in, self.H, self.D_out = D_in, H, D_out
        self.compute_dtype = jnp.dtype(compute_dtype)
        cb = self.compute_dtype.itemsize
        self.sub = 16 if cb == 2 else 8        # sublane packing granularity
        ob = 4                                  # budget output tiles as f32

        vmem_cap, align = _chip_info()
        self.vmem_cap, self.align = vmem_cap, align
        budget = int(0.80 * vmem_cap)           # leave Mosaic-scratch headroom
        if row_tile is None:
            # 128 MiB-class chips (v5e/v6e) want 512-1024 row tiles; 64 MiB
            # v7x targets ~640 rows per TensorCore.
            row_tile = 1024 if vmem_cap >= 96 * 2**20 else 640

        D_in_p = _round_up(D_in, align)
        H_base = _round_up(H, align)
        Do_base = _round_up(D_out, align)

        def vmem_need(tm, tk, tn):
            n = 2 * tm * D_in_p * cb            # x tile (double-buffered)
            n += 2 * D_in_p * tk * cb           # W1 tile
            n += 2 * 8 * tk * 4                 # b1 tile (f32, 8-sublane pad)
            n += 2 * tk * tn * cb               # W2 tile
            n += 2 * 8 * tn * 4                 # b2 tile
            n += 2 * tm * tn * ob               # output tile
            n += tm * tn * 4                    # f32 accumulator / resident out
            n += tm * tk * 4 + tm * tk * cb     # hidden intermediate (f32+bf16)
            n += tm * tn * 4                    # second-matmul result temp
            return n

        # Nominal steady-state row count for scoring the tile choice.
        M_nom = _round_up(max(2 * row_tile, 2048), self.sub)

        def score(tm, tk, tn):
            n_i = -(-M_nom // tm)
            M_pad = n_i * tm
            H_pp = _round_up(H, tk); n_k = H_pp // tk
            Do_pp = _round_up(D_out, tn); n_j = Do_pp // tn
            w1_b = D_in_p * H_pp * cb
            w2_b = H_pp * Do_pp * cb
            w1_reads = 1 if (n_k == 1 or n_i * n_j == 1) else n_i * n_j
            w2_reads = 1 if (n_i == 1 or (n_k == 1 and n_j == 1)) else n_i
            traffic = (M_pad * D_in_p * cb + w1_reads * w1_b
                       + w2_reads * w2_b + M_pad * Do_pp * ob)
            recompute = (n_j - 1) * M_pad * H_pp * 4   # re-doing x@W1 per N tile
            steps = n_i * n_j * n_k                    # ~0.35 us each
            return traffic + recompute + steps * 300_000

        def dim_cands(base, step):
            fixed = (8192, 4096, 3072, 2048, 1536, 1024, 768, 512, 384, 256, 128)
            vals = {base, step}
            vals |= {v for v in fixed if step <= v < base and v % step == 0}
            return sorted(vals, reverse=True)

        tm_cap = _round_up(max(row_tile, self.sub), self.sub)
        tm_fixed = (1024, 896, 768, 640, 512, 448, 384, 320, 256, 192,
                    128, 96, 64, 48, 32, 16, 8)
        tm_cands = sorted({tm_cap} | {_round_up(v, self.sub)
                                      for v in tm_fixed if v <= tm_cap},
                          reverse=True)
        tk_cands = dim_cands(H_base, align)
        tn_cands = dim_cands(Do_base, align)

        best = None
        for tk in tk_cands:
            for tn in tn_cands:
                for tm in tm_cands:
                    if vmem_need(tm, tk, tn) > budget:
                        continue
                    key = (score(tm, tk, tn), -tm, -tk, -tn)
                    if best is None or key < best[0]:
                        best = (key, tm, tk, tn)
        if best is None:
            # Pathologically large dims: smallest legal tiles; vmem_limit will
            # stretch toward capacity below.
            tm_sel, tk_sel, tn_sel = tm_cands[-1], align, align
        else:
            _, tm_sel, tk_sel, tn_sel = best

        self.tm_max, self.tk, self.tn = tm_sel, tk_sel, tn_sel
        self.D_in_p = D_in_p
        self.H_p = _round_up(H, tk_sel)
        self.Do_p = _round_up(D_out, tn_sel)
        self._vmem_need = vmem_need

        # Pad + cast parameters ONCE (off the per-call path). Zero padding is
        # mathematically inert: padded h columns are relu(0)=0 and the matching
        # W2 rows / b2 entries are 0.
        self.w1 = jnp.pad(w1, ((0, D_in_p - D_in),
                               (0, self.H_p - H))).astype(self.compute_dtype)
        self.w2 = jnp.pad(w2, ((0, self.H_p - H),
                               (0, self.Do_p - D_out))).astype(self.compute_dtype)
        self.b1 = jnp.pad(b1, (0, self.H_p - H)).astype(jnp.float32).reshape(1, self.H_p)
        self.b2 = jnp.pad(b2, (0, self.Do_p - D_out)).astype(jnp.float32).reshape(1, self.Do_p)

    def __call__(self, x):
        assert x.shape[-1] == self.D_in
        lead = x.shape[:-1]
        M = 1
        for d in lead:
            M *= d

        tm = min(self.tm_max, _round_up(max(M, 1), self.sub))
        M_pad = _round_up(M, tm)
        n_i = M_pad // tm
        n_j = self.Do_p // self.tn
        n_k = self.H_p // self.tk

        x2 = jnp.pad(x.reshape(M, self.D_in),
                     ((0, M_pad - M), (0, self.D_in_p - self.D_in)))
        x2 = x2.astype(self.compute_dtype)

        out_dtype = x.dtype
        f32_out = jnp.dtype(out_dtype) == jnp.dtype(jnp.float32)
        if f32_out:
            kernel = _ff_kernel_f32_out
            scratch = []
        else:
            kernel = _ff_kernel_scratch
            scratch = [pltpu.VMEM((tm, self.tn), jnp.float32)]

        need = self._vmem_need(tm, self.tk, self.tn)
        vmem_limit = int(min(0.85 * self.vmem_cap,
                             max(32 * 2**20, need + 16 * 2**20)))
        vmem_limit = int(min(max(vmem_limit, need + 2 * 2**20),
                             0.95 * self.vmem_cap))

        cb = self.compute_dtype.itemsize
        ob = jnp.dtype(out_dtype).itemsize
        w1_reads = 1 if (n_k == 1 or n_i * n_j == 1) else n_i * n_j
        w2_reads = 1 if (n_i == 1 or (n_k == 1 and n_j == 1)) else n_i
        cost = pl.CostEstimate(
            flops=2 * M * (self.D_in * self.H + self.H * self.D_out),
            transcendentals=0,
            bytes_accessed=int(M_pad * self.D_in_p * cb
                               + w1_reads * self.w1.size * cb
                               + w2_reads * self.w2.size * cb
                               + self.b1.size * 4 + self.b2.size * 4
                               + M_pad * self.Do_p * ob))

        out2 = pl.pallas_call(
            kernel,
            out_shape=jax.ShapeDtypeStruct((M_pad, self.Do_p), out_dtype),
            grid_spec=pltpu.PrefetchScalarGridSpec(
                num_scalar_prefetch=0,
                # rows (parallel), D_out tiles (parallel), hidden chunks (reduction, last)
                grid=(n_i, n_j, n_k),
                in_specs=[
                    pl.BlockSpec((tm, self.D_in_p), lambda i, j, k: (i, 0)),     # x rows
                    pl.BlockSpec((self.D_in_p, self.tk), lambda i, j, k: (0, k)),  # W1[:, k]
                    pl.BlockSpec((1, self.tk), lambda i, j, k: (0, k)),          # b1[k]
                    pl.BlockSpec((self.tk, self.tn), lambda i, j, k: (k, j)),    # W2[k, j]
                    pl.BlockSpec((1, self.tn), lambda i, j, k: (0, j)),          # b2[j]
                ],
                out_specs=pl.BlockSpec((tm, self.tn), lambda i, j, k: (i, j)),
                scratch_shapes=scratch,
            ),
            compiler_params=pltpu.CompilerParams(
                dimension_semantics=("parallel", "parallel", "arbitrary"),
                vmem_limit_bytes=vmem_limit),
            cost_estimate=cost,
        )(x2, self.w1, self.b1, self.w2, self.b2)

        return out2[:M, :self.D_out].reshape(*lead, self.D_out)


def feedforward(x, w1, b1, w2, b2, **kwargs):
    """One-shot convenience wrapper (pads/casts weights on every call)."""
    return PallasFeedForward(w1, b1, w2, b2, **kwargs)(x)


# --------------------------------- tests ----------------------------------- #

if __name__ == "__main__":
    key = jax.random.PRNGKey(0)

    def make_params(k, d_in, d_h, d_out):
        kw1, kb1, kw2, kb2 = jax.random.split(k, 4)
        # PyTorch nn.Linear weights are (out, in); transpose to (in, out).
        w1 = (jax.random.normal(kw1, (d_h, d_in), jnp.float32) * 0.1).T
        b1 = jax.random.normal(kb1, (d_h,), jnp.float32) * 0.1
        w2 = (jax.random.normal(kw2, (d_out, d_h), jnp.float32) * 0.1).T
        b2 = jax.random.normal(kb2, (d_out,), jnp.float32) * 0.1
        return w1, b1, w2, b2

    def ref_mixed(x, w1, b1, w2, b2, cd=jnp.bfloat16):
        # Same math as the kernel: bf16 operands, f32 accumulation/epilogue.
        h = jnp.dot(x.astype(cd), w1.astype(cd),
                    preferred_element_type=jnp.float32) + b1
        h = jnp.maximum(h, 0.0)
        o = jnp.dot(h.astype(cd), w2.astype(cd),
                    preferred_element_type=jnp.float32) + b2
        return o.astype(x.dtype)

    # --- Case 1: small shapes implied by the module --------------------------
    B, S, d_in, d_h, d_out = 2, 8, 16, 32, 16
    kx, kp, key = jax.random.split(key, 3)
    x = jax.random.normal(kx, (B, S, d_in), jnp.float32)
    w1, b1, w2, b2 = make_params(kp, d_in, d_h, d_out)

    ff = PallasFeedForward(w1, b1, w2, b2)
    out = jax.block_until_ready(ff(x))
    assert out.shape == (B, S, d_out)
    ref_bf = ref_mixed(x, w1, b1, w2, b2)
    ref_f32 = jnp.maximum(x @ w1 + b1, 0.0) @ w2 + b2
    assert jnp.allclose(out, ref_bf, atol=2e-3, rtol=2e-3), "mismatch vs mixed-precision ref"
    assert jnp.allclose(out, ref_f32, atol=5e-2, rtol=5e-2), "mismatch vs f32 ref"

    # --- Case 2: awkward hidden dim + multiple row tiles ----------------------
    B, S, d_in, d_h, d_out = 2, 128, 128, 384, 128
    kx, kp, key = jax.random.split(key, 3)
    x = jax.random.normal(kx, (B, S, d_in), jnp.float32)
    w1, b1, w2, b2 = make_params(kp, d_in, d_h, d_out)

    ff = PallasFeedForward(w1, b1, w2, b2, row_tile=128)
    out = jax.block_until_ready(ff(x))
    assert out.shape == (B, S, d_out)
    ref_bf = ref_mixed(x, w1, b1, w2, b2)
    ref_f32 = jnp.maximum(x @ w1 + b1, 0.0) @ w2 + b2
    assert jnp.allclose(out, ref_bf, atol=5e-3, rtol=5e-3), "mismatch vs mixed-precision ref"
    assert jnp.allclose(out, ref_f32, atol=1e-1, rtol=1e-1), "mismatch vs f32 ref"

    print("KERNEL_OK")
</pallas_src>

<mosaic_0001>
module attributes {stable_mosaic.version = 11 : i64} {
  func.func @_ff_kernel_f32_out(%arg0: i32, %arg1: i32, %arg2: i32, %arg3: memref<16x128xbf16, #tpu.memory_space<vmem>>, %arg4: memref<128x128xbf16, #tpu.memory_space<vmem>>, %arg5: memref<1x128xf32, #tpu.memory_space<vmem>>, %arg6: memref<128x128xbf16, #tpu.memory_space<vmem>>, %arg7: memref<1x128xf32, #tpu.memory_space<vmem>>, %arg8: memref<16x128xf32, #tpu.memory_space<vmem>>) attributes {dimension_semantics = [#tpu.dimension_semantics<parallel>, #tpu.dimension_semantics<parallel>, #tpu.dimension_semantics<arbitrary>], iteration_bounds = array<i64: 1, 1, 1>, scalar_prefetch = 0 : i64, scratch_operands = 0 : i64, tpu.core_type = #tpu.core_type<tc>, window_params = [{transform_indices = @transform_0, window_bounds = array<i64: 16, 128>}, {transform_indices = @transform_1, window_bounds = array<i64: 128, 128>}, {transform_indices = @transform_2, window_bounds = array<i64: 1, 128>}, {transform_indices = @transform_3, window_bounds = array<i64: 128, 128>}, {transform_indices = @transform_4, window_bounds = array<i64: 1, 128>}, {transform_indices = @transform_5, window_bounds = array<i64: 16, 128>}]} {
    %c0_i32 = arith.constant 0 : i32
    %0 = arith.cmpi eq, %arg2, %c0_i32 : i32
    %1 = arith.extui %0 : i1 to i32
    %c0_i32_0 = arith.constant 0 : i32
    %2 = arith.cmpi ne, %1, %c0_i32_0 : i32
    scf.if %2 {
      %c0_14 = arith.constant 0 : index
      %c0_15 = arith.constant 0 : index
      %17 = vector.load %arg7[%c0_14, %c0_15] : memref<1x128xf32, #tpu.memory_space<vmem>>, vector<1x128xf32>
      %18 = vector.shape_cast %17 : vector<1x128xf32> to vector<1x128xf32>
      %19 = vector.broadcast %18 : vector<1x128xf32> to vector<16x128xf32>
      %c0_16 = arith.constant 0 : index
      %c0_17 = arith.constant 0 : index
      %20 = vector.load %arg8[%c0_16, %c0_17] : memref<16x128xf32, #tpu.memory_space<vmem>>, vector<16x128xf32>
      tpu.vector_store %arg8[%c0_16, %c0_17], %19 {strides = array<i32>} : memref<16x128xf32, #tpu.memory_space<vmem>>, vector<16x128xf32>,
    } else {
    }
    %c0 = arith.constant 0 : index
    %c0_1 = arith.constant 0 : index
    %3 = vector.load %arg3[%c0, %c0_1] : memref<16x128xbf16, #tpu.memory_space<vmem>>, vector<16x128xbf16>
    %c0_2 = arith.constant 0 : index
    %c0_3 = arith.constant 0 : index
    %4 = vector.load %arg4[%c0_2, %c0_3] : memref<128x128xbf16, #tpu.memory_space<vmem>>, vector<128x128xbf16>
    %cst = arith.constant dense<0.000000e+00> : vector<16x128xf32>
    %5 = tpu.matmul %3, %4, %cst {dimension_numbers = #tpu.dot_dimension_numbers<[1], [0], [0], [1], [0, 0, 1, 1], [], []>} : vector<16x128xbf16>, vector<128x128xbf16>, vector<16x128xf32> -> vector<16x128xf32>
    %c0_4 = arith.constant 0 : index
    %c0_5 = arith.constant 0 : index
    %6 = vector.load %arg5[%c0_4, %c0_5] : memref<1x128xf32, #tpu.memory_space<vmem>>, vector<1x128xf32>
    %7 = vector.broadcast %6 : vector<1x128xf32> to vector<16x128xf32>
    %8 = arith.addf %5, %7 : vector<16x128xf32>
    %cst_6 = arith.constant 0.000000e+00 : f32
    %9 = vector.broadcast %cst_6 : f32 to vector<16x128xf32>
    %10 = arith.maximumf %8, %9 : vector<16x128xf32>
    %c0_7 = arith.constant 0 : index
    %c0_8 = arith.constant 0 : index
    %11 = vector.load %arg8[%c0_7, %c0_8] : memref<16x128xf32, #tpu.memory_space<vmem>>, vector<16x128xf32>
    %12 = arith.truncf %10 : vector<16x128xf32> to vector<16x128xbf16>
    %c0_9 = arith.constant 0 : index
    %c0_10 = arith.constant 0 : index
    %13 = vector.load %arg6[%c0_9, %c0_10] : memref<128x128xbf16, #tpu.memory_space<vmem>>, vector<128x128xbf16>
    %cst_11 = arith.constant dense<0.000000e+00> : vector<16x128xf32>
    %14 = tpu.matmul %12, %13, %cst_11 {dimension_numbers = #tpu.dot_dimension_numbers<[1], [0], [0], [1], [0, 0, 1, 1], [], []>} : vector<16x128xbf16>, vector<128x128xbf16>, vector<16x128xf32> -> vector<16x128xf32>
    %15 = arith.addf %11, %14 : vector<16x128xf32>
    %c0_12 = arith.constant 0 : index
    %c0_13 = arith.constant 0 : index
    %16 = vector.load %arg8[%c0_12, %c0_13] : memref<16x128xf32, #tpu.memory_space<vmem>>, vector<16x128xf32>
    tpu.vector_store %arg8[%c0_12, %c0_13], %15 {strides = array<i32>} : memref<16x128xf32, #tpu.memory_space<vmem>>, vector<16x128xf32>,
    return
  }
  func.func @transform_0(%arg0: i32, %arg1: i32, %arg2: i32) -> (i32, i32) {
    %c0_i32 = arith.constant 0 : i32
    %c0_i32_0 = arith.constant 0 : i32
    return %arg0, %c0_i32 : i32, i32
  }
  func.func @transform_1(%arg0: i32, %arg1: i32, %arg2: i32) -> (i32, i32) {
    %c0_i32 = arith.constant 0 : i32
    %c0_i32_0 = arith.constant 0 : i32
    return %c0_i32, %arg2 : i32, i32
  }
  func.func @transform_2(%arg0: i32, %arg1: i32, %arg2: i32) -> (i32, i32) {
    %c0_i32 = arith.constant 0 : i32
    %c0_i32_0 = arith.constant 0 : i32
    return %c0_i32, %arg2 : i32, i32
  }
  func.func @transform_3(%arg0: i32, %arg1: i32, %arg2: i32) -> (i32, i32) {
    %c0_i32 = arith.constant 0 : i32
    return %arg2, %arg1 : i32, i32
  }
  func.func @transform_4(%arg0: i32, %arg1: i32, %arg2: i32) -> (i32, i32) {
    %c0_i32 = arith.constant 0 : i32
    %c0_i32_0 = arith.constant 0 : i32
    return %c0_i32, %arg1 : i32, i32
  }
  func.func @transform_5(%arg0: i32, %arg1: i32, %arg2: i32) -> (i32, i32) {
    %c0_i32 = arith.constant 0 : i32
    return %arg0, %arg1 : i32, i32
  }
}

</mosaic_0001>

<bundles_post_ra>
// kernel: tpu_custom_call.1
= control target key start
LH: loop header
LB: loop body
LE: loop exit
PB: predicated region body
PF: predicated region fallthrough
CT: control target
= control target key end

     0   :  { %10 = vsyncpa [#allocation3], 0  ;;  %s576_s0 = inlined_call_operand.hbm [shape: bf16[16,128], index: 0, kind: input, shape index: {}]   ;;  %s577_s1 = inlined_call_operand.hbm [shape: bf16[128,128], index: 1, kind: input, shape index: {}]   ;;  %s578_s2 = inlined_call_operand.vmem [shape: f32[1,128], index: 2, kind: input, shape index: {}]   ;;  %s579_s3 = inlined_call_operand.hbm [shape: bf16[128,128], index: 3, kind: input, shape index: {}]   ;;  %s580_s4 = inlined_call_operand.vmem [shape: f32[1,128], index: 4, kind: input, shape index: {}]   ;;  %s581_s5 = inlined_call_operand.hbm [shape: f32[16,128], index: 5, kind: output, shape index: {}]  }
   0x1   :  { %11 = vsyncpa [#allocation6], 0 }
   0x2   :  { %12 = vsyncpa [#allocation4], 0  ;;  %s518_s18 = smov [#allocation5]   ;;  %s519_s20 = smov [#allocation2]  }
   0x3   :  { %s30_s19 = sshll.u32 %s518_s18, 4  ;;  %s18_s21 = sshll.u32 %s519_s20, 4  ;;  %s31_s19 = int_to_ptr.vmem [resolvable:$true] %s30_s19  ;;  %s19_s21 = int_to_ptr.vmem [resolvable:$true] %s18_s21 }
   0x4   :  { %s440_s22 = scalar_lea.vmem %s31_s19, 1024  ;;  %p445_p1 = scmp.lt.s32.totalorder %s31_s19, %s31_s19 }
   0x5   :  { %p441_p0 = scmp.ne.s32.totalorder %s31_s19, %s440_s22  ;;  %p446_p2 = scmp.lt.s32.totalorder %s440_s22, %s440_s22 }
   0x7   :  { %p447_p3 = por %p446_p2, %p445_p1 }
   0x9   :  { %p448_p4 = pnand %p447_p3, %p441_p0 }
   0xb   :  { %451 = shalt.err (!%p448_p4)
}
   0xc   :  { %s520_s23 = smov 64   ;;  %s521_s24 = smov 4  }
   0xd   :  { %36 = dma.hbm_to_vmem [thread:$0]  %s577_s1, 1024, %s31_s19, [#allocation6], %s520_s23, %s520_s23, %s521_s24  }
   0xe   :  { %s460_s27 = scalar_lea.vmem %s19_s21, 128  ;;  %p465_p6 = scmp.lt.s32.totalorder %s19_s21, %s19_s21 }
   0xf   :  { %p461_p5 = scmp.ne.s32.totalorder %s19_s21, %s460_s27  ;;  %p466_p7 = scmp.lt.s32.totalorder %s460_s27, %s460_s27 }
  0x11   :  { %p467_p8 = por %p466_p7, %p465_p6 }
  0x13   :  { %p468_p9 = pnand %p467_p8, %p461_p5 }
  0x15   :  { %471 = shalt.err (!%p468_p9)
}
  0x16   :  { %24 = dma.hbm_to_vmem [thread:$0]  %s576_s0, 128, %s19_s21, [#allocation3], %s520_s23, %s520_s23, %s521_s24  }
  0x17   :  { %s522_s30 = smov [#allocation7]  }
  0x18   :  { %s44_s6 = sshll.u32 %s522_s30, 4  ;;  %s45_s6 = int_to_ptr.vmem [resolvable:$true] %s44_s6 }
  0x19   :  { %s480_s7 = scalar_lea.vmem %s45_s6, 1024  ;;  %p485_p11 = scmp.lt.s32.totalorder %s45_s6, %s45_s6 }
  0x1a   :  { %p481_p10 = scmp.ne.s32.totalorder %s45_s6, %s480_s7  ;;  %p486_p12 = scmp.lt.s32.totalorder %s480_s7, %s480_s7 }
  0x1c   :  { %p487_p13 = por %p486_p12, %p485_p11 }
  0x1e   :  { %p488_p0 = pnand %p487_p13, %p481_p10 }
  0x20   :  { %491 = shalt.err (!%p488_p0)
}
  0x21   :  { %50 = dma.hbm_to_vmem [thread:$0]  %s579_s3, 1024, %s45_s6, [#allocation6], %s520_s23, %s520_s23, %s521_s24  }
  0x22   :  { %512 = dma.done.wait [#allocation3], 128  }
  0x23   :  { %513 = vsyncadd [#allocation3], 4294967168 }
  0x24   :  { %514 = dma.done.wait [#allocation6], 2048  }
  0x25   :  { %515 = vsyncadd [#allocation6], 4294965248  ;;  %v523_v0 = vmov 0.0   ;;  %vm524_vm0 = vmmov 0   ;;  %v415_v1 = vld [vmem:[#allocation5 + $0x38] sm:$0xff]   ;;  %v416_v2 = vld [vmem:[#allocation5 + $0x30] sm:$0xff]  }
  0x26   :  { %365 = vmatprep.subr.bf16.mxu0 %v523_v0  ;;  %381 = vmatprep.mubr.msk.bf16.mxu0 %vm524_vm0, %v523_v0  ;;  %v417_v3 = vld [vmem:[#allocation5 + $0x28] sm:$0xff]   ;;  %v424_v4 = vld [vmem:[#allocation7 + $0x38] sm:$0xff]   ;;  %v418_v5 = vld [vmem:[#allocation5 + $0x20] sm:$0xff]   ;;  %s525_s11 = smov [#allocation8]  }
  0x27   :  { %385 = vmatprep.subr.bf16.mxu1 %v523_v0  ;;  %401 = vmatprep.mubr.msk.bf16.mxu1 %vm524_vm0, %v523_v0  ;;  %v425_v6 = vld [vmem:[#allocation7 + $0x30] sm:$0xff]   ;;  %v419_v7 = vld [vmem:[#allocation5 + $0x18] sm:$0xff]   ;;  %v426_v8 = vld [vmem:[#allocation7 + $0x28] sm:$0xff]   ;;  %s315_s12 = sshll.u32 %s525_s11, 4  ;;  %s316_s12 = int_to_ptr.vmem [resolvable:$true] %s315_s12 }
  0x28   :  { %366 = vmatpush3.bf16.msra.mxu0 %v415_v1  ;;  %386 = vmatpush3.bf16.msra.mxu1 %v424_v4  ;;  %v420_v9 = vld [vmem:[#allocation5 + $0x10] sm:$0xff]   ;;  %v427_v10 = vld [vmem:[#allocation7 + $0x20] sm:$0xff]   ;;  %v421_v11 = vld [vmem:[#allocation5 + $0x8] sm:$0xff]   ;;  %p497_p2 = scmp.lt.s32.totalorder %s316_s12, %s316_s12 }
  0x29   :  { %367 = vmatprep.subr.bf16.mxu0 %v523_v0  ;;  %387 = vmatprep.subr.bf16.mxu1 %v523_v0  ;;  %v428_v12 = vld [vmem:[#allocation7 + $0x18] sm:$0xff]   ;;  %v422_v13 = vld [vmem:[#allocation5] sm:$0xff]   ;;  %v429_v15 = vld [vmem:[#allocation7 + $0x10] sm:$0xff]  }
  0x2a   :  { %v423_v14 = vld [vmem:[#allocation2] sm:$0xff]   ;;  %v430_v16 = vld [vmem:[#allocation7 + $0x8] sm:$0xff]   ;;  %v431_v17 = vld [vmem:[#allocation7] sm:$0xff]  }
  0x2b   :  { %v329_v18 = vld [vmem:[%s578_s2] ss:$0 sm:$0xff]  ;;  %s492_s2 = scalar_lea.vmem %s316_s12, 256 }
  0x2c   :  { %368 = vmatpush3.bf16.msra.mxu0 %v416_v2  ;;  %388 = vmatpush3.bf16.msra.mxu1 %v425_v6  ;;  %v328_v28 = vld [vmem:[%s580_s4] ss:$0 sm:$0xff]  ;;  %p493_p1 = scmp.ne.s32.totalorder %s316_s12, %s492_s2  ;;  %p498_p3 = scmp.lt.s32.totalorder %s492_s2, %s492_s2 }
  0x2d   :  { %369 = vmatprep.subr.bf16.mxu0 %v523_v0  ;;  %389 = vmatprep.subr.bf16.mxu1 %v523_v0 }
  0x2e   :  { %p499_p4 = por %p498_p3, %p497_p2 }
  0x30   :  { %370 = vmatpush3.bf16.msra.mxu0 %v417_v3  ;;  %390 = vmatpush3.bf16.msra.mxu1 %v426_v8  ;;  %p500_p5 = pnand %p499_p4, %p493_p1 }
  0x31   :  { %371 = vmatprep.subr.bf16.mxu0 %v523_v0  ;;  %391 = vmatprep.subr.bf16.mxu1 %v523_v0 }
  0x34   :  { %372 = vmatpush3.bf16.msra.mxu0 %v418_v5  ;;  %392 = vmatpush3.bf16.msra.mxu1 %v427_v10 }
  0x35   :  { %373 = vmatprep.subr.bf16.mxu0 %v523_v0  ;;  %393 = vmatprep.subr.bf16.mxu1 %v523_v0 }
  0x38   :  { %374 = vmatpush3.bf16.msra.mxu0 %v419_v7  ;;  %394 = vmatpush3.bf16.msra.mxu1 %v428_v12 }
  0x39   :  { %375 = vmatprep.subr.bf16.mxu0 %v523_v0  ;;  %395 = vmatprep.subr.bf16.mxu1 %v523_v0 }
  0x3c   :  { %376 = vmatpush3.bf16.msra.mxu0 %v420_v9  ;;  %396 = vmatpush3.bf16.msra.mxu1 %v429_v15 }
  0x3d   :  { %377 = vmatprep.subr.bf16.mxu0 %v523_v0  ;;  %397 = vmatprep.subr.bf16.mxu1 %v523_v0 }
  0x40   :  { %378 = vmatpush3.bf16.msra.mxu0 %v421_v11  ;;  %398 = vmatpush3.bf16.msra.mxu1 %v430_v16 }
  0x41   :  { %379 = vmatprep.subr.bf16.mxu0 %v523_v0  ;;  %399 = vmatprep.subr.bf16.mxu1 %v523_v0 }
  0x44   :  { %380 = vmatpush3.bf16.msra.mxu0 %v422_v13  ;;  %400 = vmatpush3.bf16.msra.mxu1 %v431_v17 }
  0x47   :  { %382 = vmatmul.mubr.bf16.vlgmr.msra.gmra.mxu0 %v423_v14 }
 0x107   :  { %v189_v19 = vpop.f32.mrf.mxu0 }
 0x108   :  { %v190_v21 = vadd.f32 %v329_v18, %v189_v19 }
 0x109   :  { %v383_v20 = vpop.f32.mrf.mxu0 }
 0x10a   :  { %v196_v25 = vmax.f32 %v190_v21, 0.0 }
 0x10b   :  { %v192_v22 = vpop.f32.mrf.mxu0 }
 0x10c   :  { %v193_v23 = vadd.f32 %v329_v18, %v192_v22 }
 0x10d   :  { %v384_v24 = vpop.f32.mrf.mxu0 }
 0x10e   :  { %v197_v26 = vmax.f32 %v193_v23, 0.0 }
 0x110   :  { %v200_v27 = vpack.c.bf16 %v197_v26, %v196_v25 }
 0x112   :  { %402 = vmatmul.mubr.bf16.vlgmr.msra.gmra.mxu1 %v200_v27 }
 0x1d2   :  { %v299_v29 = vpop.f32.mrf.mxu1 }
 0x1d3   :  { %v306_v30 = vadd.f32 %v328_v28, %v299_v29 }
 0x1d4   :  { %v403_v31 = vpop.f32.mrf.mxu1 }
 0x1d5   :  { %308 = vst [vmem:[#allocation8] sm:$0xff] %v306_v30 }
 0x1d6   :  { %v302_v32 = vpop.f32.mrf.mxu1 }
 0x1d7   :  { %v307_v33 = vadd.f32 %v328_v28, %v302_v32 }
 0x1d8   :  { %v404_v34 = vpop.f32.mrf.mxu1 }
 0x1d9   :  { %309 = vst [vmem:[#allocation8 + $0x8] sm:$0xff] %v307_v33 }
 0x1da   :  { %503 = shalt.err (!%p500_p5)
}
 0x1db   :  { %s526_s13 = smov 128   ;;  %s527_s4 = smov 8  }
 0x1dc   :  { %321 = dma.vmem_to_hbm [thread:$0]  %s316_s12, 256, %s581_s5, [#allocation4], %s526_s13, %s526_s13, %s527_s4  }
 0x1dd   :  { %516 = dma.done.wait [#allocation4], 256  }
 0x1de   :  { %517 = vsyncadd [#allocation4], 4294967040 }
 0x1df   :  { %325 = vsyncpa [#allocation3], 1 }
 0x1e0   :  { %326 = vsyncpa [#allocation6], 1 }
 0x1e1   :  { %327 = vsyncpa [#allocation4], 1 }

</bundles_post_ra>
